<compile_context>
chip_gen: v7x
topology: tpu7x:2x2x1
jax: 0.10.0
libtpu: 0.0.40
codegen_flags: <defaults>
</compile_context>

<pallas_src>
import functools

import jax
import jax.numpy as jnp
from jax.experimental import pallas as pl
from jax.experimental.pallas import tpu as pltpu

_LANE = 128
_SUBLANE_BF16 = 16        # a bf16 vreg packs 16 sublanes
_MAX_TILE_B = 512         # safe on v5e's 16 MiB scoped-VMEM default
_NEG_BIG = -1e30          # padded-logit bias -> exp underflows to exactly 0


def _round_up(n, m):
    return ((n + m - 1) // m) * m


def _hash_u32(x):
    """lowbias32-style avalanche hash on uint32 (counter-based dropout PRNG)."""
    x = x ^ (x >> 16)
    x = x * jnp.uint32(0x7FEB352D)
    x = x ^ (x >> 15)
    x = x * jnp.uint32(0x846CA68B)
    x = x ^ (x >> 16)
    return x


# ----------------------------------------------------------------------------
# Kernel (eval / train share one body; `training` is a static Python bool)
# ----------------------------------------------------------------------------
def _top_model_kernel(seed_ref, twv_ref, rel_ref, mem_ref,
                      w1a_ref, w1b_ref, w1c_ref, b1_ref, w2_ref, b2_ref,
                      outp_ref, prob_ref, *, training, tile_b):
    f32 = jnp.float32

    # hid2state as three partial dots against pre-split row blocks of W1
    # (removes the wrapper concat+pad HBM round trip); f32 MXU accumulation.
    h = jnp.dot(twv_ref[...], w1a_ref[...], preferred_element_type=f32)
    h = h + jnp.dot(rel_ref[...], w1b_ref[...], preferred_element_type=f32)
    h = h + jnp.dot(mem_ref[...], w1c_ref[...], preferred_element_type=f32)
    h = jnp.tanh(h + b1_ref[...])                 # elementwise stays f32

    if training:
        # F.dropout default p=0.5: keep w.p. 0.5, scale kept values by 2.
        # Counter-based hash keyed on the GLOBAL element index -> mask is
        # grid/tile-invariant and lowers on every backend (no pltpu.prng_*).
        seed = seed_ref[0].astype(jnp.uint32) * jnp.uint32(0x9E3779B9)
        row = jax.lax.broadcasted_iota(jnp.int32, h.shape, 0).astype(jnp.uint32)
        col = jax.lax.broadcasted_iota(jnp.int32, h.shape, 1).astype(jnp.uint32)
        grow = pl.program_id(0).astype(jnp.uint32) * jnp.uint32(tile_b) + row
        gidx = grow * jnp.uint32(h.shape[1]) + col
        keep = (_hash_u32(gidx ^ seed) >> 31).astype(f32)
        h = h * (keep * 2.0)

    outp_ref[...] = h.astype(outp_ref.dtype)      # lane-dense (tile_b, SP)

    # state2prob + softmax.  Padded columns carry a -1e30 bias, so softmax
    # over the padded row == softmax over the real rel_count+1 columns.
    logits = jnp.dot(h.astype(w2_ref.dtype), w2_ref[...],
                     preferred_element_type=f32) + b2_ref[...]
    m = jnp.max(logits, axis=-1, keepdims=True)
    e = jnp.exp(logits - m)
    s = jnp.sum(e, axis=-1, keepdims=True)
    r = pl.reciprocal(s, approx=True)             # EUP slot (otherwise idle)
    r = r * (2.0 - s * r)                         # one Newton step -> ~f32
    prob_ref[...] = (e * r).astype(prob_ref.dtype)   # lane-dense store


# ----------------------------------------------------------------------------
# Parameter preparation (padding / casting / W1 split done ONCE)
# ----------------------------------------------------------------------------
def prepare_params(raw_params, *, dim, statedim, mxu_dtype=jnp.bfloat16):
    """Split W1 into the three input row-blocks, pad columns to multiples of
    128 and pre-cast to the MXU dtype.  Zero rows/cols are mathematical
    no-ops; padded softmax columns get a -1e30 bias so their probability is 0."""
    w1_t, b1, w2_t, b2 = raw_params                # (K,S), (S,), (S,N), (N,)
    K, S = w1_t.shape
    N = w2_t.shape[1]
    d1, d2, d3 = 2 * dim, dim, statedim
    assert K == d1 + d2 + d3 and S == statedim
    SP, NP = _round_up(S, _LANE), _round_up(N, _LANE)

    def padcols(w):
        return jnp.zeros((w.shape[0], SP), mxu_dtype).at[:, :S].set(
            w.astype(mxu_dtype))

    w1a = padcols(w1_t[:d1])
    w1b = padcols(w1_t[d1:d1 + d2])
    w1c = padcols(w1_t[d1 + d2:])
    b1p = jnp.zeros((1, SP), jnp.float32).at[0, :S].set(b1.astype(jnp.float32))
    w2p = jnp.zeros((SP, NP), mxu_dtype).at[:S, :N].set(w2_t.astype(mxu_dtype))
    b2p = jnp.full((1, NP), _NEG_BIG, jnp.float32).at[0, :N].set(
        b2.astype(jnp.float32))
    return (w1a, w1b, w1c, b1p, w2p, b2p)


# ----------------------------------------------------------------------------
# Wrappers
# ----------------------------------------------------------------------------
def top_model_forward_batched(padded_weights, top_word_vec, rel_vec, memory,
                              dropout_seed=0, *, statedim, nprob,
                              training=False, tile_b=None,
                              out_dtype=jnp.float32, core_parallel=False):
    """Batched TopModel.forward.  Inputs are (B, .) arrays; returns
    (outp (B, statedim), prob (B, nprob))."""
    w1a, w1b, w1c, b1p, w2p, b2p = padded_weights
    SP, NP = w1a.shape[1], w2p.shape[1]
    mxu_dtype = w1a.dtype
    B = top_word_vec.shape[0]

    if tile_b is None:
        tile_b = min(_round_up(B, _SUBLANE_BF16), _MAX_TILE_B)
    Bp = _round_up(B, tile_b)
    grid = (Bp // tile_b,)

    def prep(a):   # cast + row-pad fused into one cheap op per input
        return jnp.pad(a.astype(mxu_dtype), ((0, Bp - B), (0, 0)))

    twv, rv, mem = prep(top_word_vec), prep(rel_vec), prep(memory)
    d1, d2, d3 = twv.shape[1], rv.shape[1], mem.shape[1]
    seed = jnp.asarray(dropout_seed, jnp.int32).reshape((1,))

    # v7x: CORE_PARALLEL shards the batch axis across both TensorCores;
    # keep single-TC when the grid has only one step (tiny B).
    sem = (pltpu.CORE_PARALLEL if (core_parallel and grid[0] > 1)
           else "parallel")

    outp_p, prob_p = pl.pallas_call(
        functools.partial(_top_model_kernel, training=training, tile_b=tile_b),
        out_shape=(jax.ShapeDtypeStruct((Bp, SP), out_dtype),
                   jax.ShapeDtypeStruct((Bp, NP), jnp.float32)),
        grid_spec=pltpu.PrefetchScalarGridSpec(
            num_scalar_prefetch=1,                              # dropout seed
            grid=grid,
            in_specs=[
                pl.BlockSpec((tile_b, d1), lambda i, s: (i, 0)),  # streamed
                pl.BlockSpec((tile_b, d2), lambda i, s: (i, 0)),  # streamed
                pl.BlockSpec((tile_b, d3), lambda i, s: (i, 0)),  # streamed
                pl.BlockSpec(w1a.shape, lambda i, s: (0, 0)),     # resident
                pl.BlockSpec(w1b.shape, lambda i, s: (0, 0)),     # resident
                pl.BlockSpec(w1c.shape, lambda i, s: (0, 0)),     # resident
                pl.BlockSpec((1, SP), lambda i, s: (0, 0)),       # resident
                pl.BlockSpec((SP, NP), lambda i, s: (0, 0)),      # resident
                pl.BlockSpec((1, NP), lambda i, s: (0, 0)),       # resident
            ],
            out_specs=(
                pl.BlockSpec((tile_b, SP), lambda i, s: (i, 0)),
                pl.BlockSpec((tile_b, NP), lambda i, s: (i, 0)),
            ),
        ),
        compiler_params=pltpu.CompilerParams(dimension_semantics=(sem,)),
    )(seed, twv, rv, mem, w1a, w1b, w1c, b1p, w2p, b2p)

    return outp_p[:B, :statedim], prob_p[:B, :nprob]


def top_model_forward(padded_weights, top_word_vec, rel_vec, memory,
                      training=False, dropout_seed=0, *, statedim, nprob):
    """Single-sample API mirroring TopModel.forward (1-D in, 1-D out)."""
    outp, prob = top_model_forward_batched(
        padded_weights, top_word_vec[None], rel_vec[None], memory[None],
        dropout_seed, statedim=statedim, nprob=nprob, training=training)
    return outp[0], prob[0]


# ----------------------------------------------------------------------------
# Deterministic parameter init (mimics nn.Linear default uniform init)
# ----------------------------------------------------------------------------
def init_params(key, dim, statedim, rel_count):
    in1 = dim * 3 + statedim
    in2 = statedim
    out2 = rel_count + 1
    k1, k2, k3, k4 = jax.random.split(key, 4)
    bound1 = 1.0 / jnp.sqrt(in1)
    bound2 = 1.0 / jnp.sqrt(in2)
    w1_t = jax.random.uniform(k1, (in1, statedim), jnp.float32, -bound1, bound1)
    b1 = jax.random.uniform(k2, (statedim,), jnp.float32, -bound1, bound1)
    w2_t = jax.random.uniform(k3, (in2, out2), jnp.float32, -bound2, bound2)
    b2 = jax.random.uniform(k4, (out2,), jnp.float32, -bound2, bound2)
    return (w1_t, b1, w2_t, b2)


def _reference(raw_params, twv, rv, mem, mxu_dtype=jnp.float32):
    """Pure-JAX reference; mirrors the kernel's operand quantization."""
    def q(a):
        return a.astype(mxu_dtype).astype(jnp.float32)
    w1_t, b1, w2_t, b2 = raw_params
    inp = jnp.concatenate([twv, rv, mem], axis=-1)
    h = jnp.tanh(jnp.dot(q(inp), q(w1_t),
                         precision=jax.lax.Precision.HIGHEST) + b1)
    logits = jnp.dot(q(h), q(w2_t), precision=jax.lax.Precision.HIGHEST) + b2
    return h, jax.nn.softmax(logits, axis=-1)


if __name__ == "__main__":
    # dim=16, statedim=32, rel_count=7 ; batch of 16 samples (one grid step)
    dim, statedim, rel_count = 16, 32, 7
    nprob = rel_count + 1
    B = 16

    key = jax.random.PRNGKey(0)
    kp, ka, kb, kc = jax.random.split(key, 4)
    raw_params = init_params(kp, dim, statedim, rel_count)

    twv = jax.random.normal(ka, (B, 2 * dim), jnp.float32)
    rv = jax.random.normal(kb, (B, dim), jnp.float32)
    mem = jax.random.normal(kc, (B, statedim), jnp.float32)

    # --- fast path: bf16 MXU operands / streaming, f32 accum & elementwise --
    params_bf16 = prepare_params(raw_params, dim=dim, statedim=statedim,
                                 mxu_dtype=jnp.bfloat16)
    fwd_eval = jax.jit(functools.partial(
        top_model_forward_batched, statedim=statedim, nprob=nprob,
        training=False))
    outp, prob = fwd_eval(params_bf16, twv, rv, mem, 0)
    jax.block_until_ready((outp, prob))

    ref_outp, ref_prob = _reference(raw_params, twv, rv, mem, jnp.bfloat16)
    assert outp.shape == (B, statedim) and prob.shape == (B, nprob)
    assert jnp.allclose(outp, ref_outp, atol=2e-3, rtol=2e-3)
    assert jnp.allclose(prob, ref_prob, atol=2e-3, rtol=2e-3)
    assert jnp.allclose(jnp.sum(prob, axis=-1), 1.0, atol=1e-4)

    # --- exact-f32 path (matches the PyTorch module numerics) ---------------
    params_f32 = prepare_params(raw_params, dim=dim, statedim=statedim,
                                mxu_dtype=jnp.float32)
    outp32, prob32 = jax.jit(functools.partial(
        top_model_forward_batched, statedim=statedim, nprob=nprob,
        training=False))(params_f32, twv, rv, mem, 0)
    jax.block_until_ready((outp32, prob32))
    ref_outp32, ref_prob32 = _reference(raw_params, twv, rv, mem, jnp.float32)
    assert jnp.allclose(outp32, ref_outp32, atol=5e-4, rtol=5e-4)
    assert jnp.allclose(prob32, ref_prob32, atol=5e-4, rtol=5e-4)

    # --- single-sample API mirroring TopModel.forward ------------------------
    o1, p1 = top_model_forward(params_bf16, twv[0], rv[0], mem[0],
                               statedim=statedim, nprob=nprob, training=False)
    jax.block_until_ready((o1, p1))
    assert jnp.allclose(o1, outp[0], atol=1e-5)
    assert jnp.allclose(p1, prob[0], atol=1e-5)

    # --- training path: dropout keeps-with-scale (0 or 2 * eval value) ------
    fwd_train = jax.jit(functools.partial(
        top_model_forward_batched, statedim=statedim, nprob=nprob,
        training=True))
    outp_t, prob_t = fwd_train(params_bf16, twv, rv, mem, 1234)
    jax.block_until_ready((outp_t, prob_t))
    is_zero = jnp.isclose(outp_t, 0.0, atol=1e-6)
    is_scaled = jnp.isclose(outp_t, 2.0 * outp, atol=1e-4, rtol=1e-4)
    assert bool(jnp.all(is_zero | is_scaled))
    assert bool(jnp.any(is_zero)) and bool(jnp.any(is_scaled))
    assert jnp.allclose(jnp.sum(prob_t, axis=-1), 1.0, atol=1e-4)

    print("KERNEL_OK")
</pallas_src>

<mosaic_0001>
module attributes {stable_mosaic.version = 11 : i64} {
  func.func @_top_model_kernel(%arg0: i32, %arg1: memref<1xi32, #tpu.memory_space<smem>>, %arg2: memref<16x32xbf16, #tpu.memory_space<vmem>>, %arg3: memref<16x16xbf16, #tpu.memory_space<vmem>>, %arg4: memref<16x32xbf16, #tpu.memory_space<vmem>>, %arg5: memref<32x128xbf16, #tpu.memory_space<vmem>>, %arg6: memref<16x128xbf16, #tpu.memory_space<vmem>>, %arg7: memref<32x128xbf16, #tpu.memory_space<vmem>>, %arg8: memref<1x128xf32, #tpu.memory_space<vmem>>, %arg9: memref<128x128xbf16, #tpu.memory_space<vmem>>, %arg10: memref<1x128xf32, #tpu.memory_space<vmem>>, %arg11: memref<16x128xf32, #tpu.memory_space<vmem>>, %arg12: memref<16x128xf32, #tpu.memory_space<vmem>>) attributes {dimension_semantics = [#tpu.dimension_semantics<parallel>], iteration_bounds = array<i64: 1>, scalar_prefetch = 1 : i64, scratch_operands = 0 : i64, tpu.core_type = #tpu.core_type<tc>, window_params = [{transform_indices = @transform_0, window_bounds = array<i64: 16, 32>}, {transform_indices = @transform_1, window_bounds = array<i64: 16, 16>}, {transform_indices = @transform_2, window_bounds = array<i64: 16, 32>}, {pipeline_mode = #tpu.pipeline_mode<synchronous>, transform_indices = @transform_3, window_bounds = array<i64: 32, 128>}, {pipeline_mode = #tpu.pipeline_mode<synchronous>, transform_indices = @transform_4, window_bounds = array<i64: 16, 128>}, {pipeline_mode = #tpu.pipeline_mode<synchronous>, transform_indices = @transform_5, window_bounds = array<i64: 32, 128>}, {pipeline_mode = #tpu.pipeline_mode<synchronous>, transform_indices = @transform_6, window_bounds = array<i64: 1, 128>}, {pipeline_mode = #tpu.pipeline_mode<synchronous>, transform_indices = @transform_7, window_bounds = array<i64: 128, 128>}, {pipeline_mode = #tpu.pipeline_mode<synchronous>, transform_indices = @transform_8, window_bounds = array<i64: 1, 128>}, {transform_indices = @transform_9, window_bounds = array<i64: 16, 128>}, {transform_indices = @transform_10, window_bounds = array<i64: 16, 128>}]} {
    %c0 = arith.constant 0 : index
    %c0_0 = arith.constant 0 : index
    %0 = vector.load %arg2[%c0, %c0_0] : memref<16x32xbf16, #tpu.memory_space<vmem>>, vector<16x32xbf16>
    %c0_1 = arith.constant 0 : index
    %c0_2 = arith.constant 0 : index
    %1 = vector.load %arg5[%c0_1, %c0_2] : memref<32x128xbf16, #tpu.memory_space<vmem>>, vector<32x128xbf16>
    %cst = arith.constant dense<0.000000e+00> : vector<16x128xf32>
    %2 = tpu.matmul %0, %1, %cst {dimension_numbers = #tpu.dot_dimension_numbers<[1], [0], [0], [1], [0, 0, 1, 1], [], []>} : vector<16x32xbf16>, vector<32x128xbf16>, vector<16x128xf32> -> vector<16x128xf32>
    %c0_3 = arith.constant 0 : index
    %c0_4 = arith.constant 0 : index
    %3 = vector.load %arg3[%c0_3, %c0_4] : memref<16x16xbf16, #tpu.memory_space<vmem>>, vector<16x16xbf16>
    %c0_5 = arith.constant 0 : index
    %c0_6 = arith.constant 0 : index
    %4 = vector.load %arg6[%c0_5, %c0_6] : memref<16x128xbf16, #tpu.memory_space<vmem>>, vector<16x128xbf16>
    %cst_7 = arith.constant dense<0.000000e+00> : vector<16x128xf32>
    %5 = tpu.matmul %3, %4, %cst_7 {dimension_numbers = #tpu.dot_dimension_numbers<[1], [0], [0], [1], [0, 0, 1, 1], [], []>} : vector<16x16xbf16>, vector<16x128xbf16>, vector<16x128xf32> -> vector<16x128xf32>
    %6 = arith.addf %2, %5 : vector<16x128xf32>
    %c0_8 = arith.constant 0 : index
    %c0_9 = arith.constant 0 : index
    %7 = vector.load %arg4[%c0_8, %c0_9] : memref<16x32xbf16, #tpu.memory_space<vmem>>, vector<16x32xbf16>
    %c0_10 = arith.constant 0 : index
    %c0_11 = arith.constant 0 : index
    %8 = vector.load %arg7[%c0_10, %c0_11] : memref<32x128xbf16, #tpu.memory_space<vmem>>, vector<32x128xbf16>
    %cst_12 = arith.constant dense<0.000000e+00> : vector<16x128xf32>
    %9 = tpu.matmul %7, %8, %cst_12 {dimension_numbers = #tpu.dot_dimension_numbers<[1], [0], [0], [1], [0, 0, 1, 1], [], []>} : vector<16x32xbf16>, vector<32x128xbf16>, vector<16x128xf32> -> vector<16x128xf32>
    %10 = arith.addf %6, %9 : vector<16x128xf32>
    %c0_13 = arith.constant 0 : index
    %c0_14 = arith.constant 0 : index
    %11 = vector.load %arg8[%c0_13, %c0_14] : memref<1x128xf32, #tpu.memory_space<vmem>>, vector<1x128xf32>
    %12 = vector.broadcast %11 : vector<1x128xf32> to vector<16x128xf32>
    %13 = arith.addf %10, %12 : vector<16x128xf32>
    %14 = math.tanh %13 : vector<16x128xf32>
    %c0_15 = arith.constant 0 : index
    %c0_16 = arith.constant 0 : index
    %15 = vector.load %arg11[%c0_15, %c0_16] : memref<16x128xf32, #tpu.memory_space<vmem>>, vector<16x128xf32>
    tpu.vector_store %arg11[%c0_15, %c0_16], %14 {strides = array<i32>} : memref<16x128xf32, #tpu.memory_space<vmem>>, vector<16x128xf32>,
    %16 = arith.truncf %14 : vector<16x128xf32> to vector<16x128xbf16>
    %c0_17 = arith.constant 0 : index
    %c0_18 = arith.constant 0 : index
    %17 = vector.load %arg9[%c0_17, %c0_18] : memref<128x128xbf16, #tpu.memory_space<vmem>>, vector<128x128xbf16>
    %cst_19 = arith.constant dense<0.000000e+00> : vector<16x128xf32>
    %18 = tpu.matmul %16, %17, %cst_19 {dimension_numbers = #tpu.dot_dimension_numbers<[1], [0], [0], [1], [0, 0, 1, 1], [], []>} : vector<16x128xbf16>, vector<128x128xbf16>, vector<16x128xf32> -> vector<16x128xf32>
    %c0_20 = arith.constant 0 : index
    %c0_21 = arith.constant 0 : index
    %19 = vector.load %arg10[%c0_20, %c0_21] : memref<1x128xf32, #tpu.memory_space<vmem>>, vector<1x128xf32>
    %20 = vector.broadcast %19 : vector<1x128xf32> to vector<16x128xf32>
    %21 = arith.addf %18, %20 : vector<16x128xf32>
    %cst_22 = arith.constant dense<0xFF800000> : vector<16xf32>
    %22 = vector.multi_reduction <maximumf>, %21, %cst_22 [1] : vector<16x128xf32> to vector<16xf32>
    %23 = vector.shape_cast %22 : vector<16xf32> to vector<16x1xf32>
    %24 = vector.broadcast %23 : vector<16x1xf32> to vector<16x128xf32>
    %25 = arith.subf %21, %24 : vector<16x128xf32>
    %26 = math.exp %25 : vector<16x128xf32>
    %cst_23 = arith.constant dense<0.000000e+00> : vector<16xf32>
    %27 = vector.multi_reduction <add>, %26, %cst_23 [1] : vector<16x128xf32> to vector<16xf32>
    %28 = vector.shape_cast %27 : vector<16xf32> to vector<16x1xf32>
    %29 = tpu.reciprocal %28 {approx = true} : vector<16x1xf32> -> vector<16x1xf32>
    %30 = arith.mulf %28, %29 : vector<16x1xf32>
    %cst_24 = arith.constant 2.000000e+00 : f32
    %31 = vector.broadcast %cst_24 : f32 to vector<16x1xf32>
    %32 = arith.subf %31, %30 : vector<16x1xf32>
    %33 = arith.mulf %29, %32 : vector<16x1xf32>
    %34 = vector.broadcast %33 : vector<16x1xf32> to vector<16x128xf32>
    %35 = arith.mulf %26, %34 : vector<16x128xf32>
    %c0_25 = arith.constant 0 : index
    %c0_26 = arith.constant 0 : index
    %36 = vector.load %arg12[%c0_25, %c0_26] : memref<16x128xf32, #tpu.memory_space<vmem>>, vector<16x128xf32>
    tpu.vector_store %arg12[%c0_25, %c0_26], %35 {strides = array<i32>} : memref<16x128xf32, #tpu.memory_space<vmem>>, vector<16x128xf32>,
    return
  }
  func.func @transform_0(%arg0: i32, %arg1: memref<1xi32, #tpu.memory_space<smem>>) -> (i32, i32) {
    %c0_i32 = arith.constant 0 : i32
    %c0_i32_0 = arith.constant 0 : i32
    return %arg0, %c0_i32 : i32, i32
  }
  func.func @transform_1(%arg0: i32, %arg1: memref<1xi32, #tpu.memory_space<smem>>) -> (i32, i32) {
    %c0_i32 = arith.constant 0 : i32
    %c0_i32_0 = arith.constant 0 : i32
    return %arg0, %c0_i32 : i32, i32
  }
  func.func @transform_2(%arg0: i32, %arg1: memref<1xi32, #tpu.memory_space<smem>>) -> (i32, i32) {
    %c0_i32 = arith.constant 0 : i32
    %c0_i32_0 = arith.constant 0 : i32
    return %arg0, %c0_i32 : i32, i32
  }
  func.func @transform_3(%arg0: i32, %arg1: memref<1xi32, #tpu.memory_space<smem>>) -> (i32, i32) {
    %c0_i32 = arith.constant 0 : i32
    %c0_i32_0 = arith.constant 0 : i32
    %c0_i32_1 = arith.constant 0 : i32
    return %c0_i32, %c0_i32_0 : i32, i32
  }
  func.func @transform_4(%arg0: i32, %arg1: memref<1xi32, #tpu.memory_space<smem>>) -> (i32, i32) {
    %c0_i32 = arith.constant 0 : i32
    %c0_i32_0 = arith.constant 0 : i32
    %c0_i32_1 = arith.constant 0 : i32
    return %c0_i32, %c0_i32_0 : i32, i32
  }
  func.func @transform_5(%arg0: i32, %arg1: memref<1xi32, #tpu.memory_space<smem>>) -> (i32, i32) {
    %c0_i32 = arith.constant 0 : i32
    %c0_i32_0 = arith.constant 0 : i32
    %c0_i32_1 = arith.constant 0 : i32
    return %c0_i32, %c0_i32_0 : i32, i32
  }
  func.func @transform_6(%arg0: i32, %arg1: memref<1xi32, #tpu.memory_space<smem>>) -> (i32, i32) {
    %c0_i32 = arith.constant 0 : i32
    %c0_i32_0 = arith.constant 0 : i32
    %c0_i32_1 = arith.constant 0 : i32
    return %c0_i32, %c0_i32_0 : i32, i32
  }
  func.func @transform_7(%arg0: i32, %arg1: memref<1xi32, #tpu.memory_space<smem>>) -> (i32, i32) {
    %c0_i32 = arith.constant 0 : i32
    %c0_i32_0 = arith.constant 0 : i32
    %c0_i32_1 = arith.constant 0 : i32
    return %c0_i32, %c0_i32_0 : i32, i32
  }
  func.func @transform_8(%arg0: i32, %arg1: memref<1xi32, #tpu.memory_space<smem>>) -> (i32, i32) {
    %c0_i32 = arith.constant 0 : i32
    %c0_i32_0 = arith.constant 0 : i32
    %c0_i32_1 = arith.constant 0 : i32
    return %c0_i32, %c0_i32_0 : i32, i32
  }
  func.func @transform_9(%arg0: i32, %arg1: memref<1xi32, #tpu.memory_space<smem>>) -> (i32, i32) {
    %c0_i32 = arith.constant 0 : i32
    %c0_i32_0 = arith.constant 0 : i32
    return %arg0, %c0_i32 : i32, i32
  }
  func.func @transform_10(%arg0: i32, %arg1: memref<1xi32, #tpu.memory_space<smem>>) -> (i32, i32) {
    %c0_i32 = arith.constant 0 : i32
    %c0_i32_0 = arith.constant 0 : i32
    return %arg0, %c0_i32 : i32, i32
  }
}

</mosaic_0001>

<bundles_post_ra>
// kernel: top_model_forward_batched.1
= control target key start
LH: loop header
LB: loop body
LE: loop exit
PB: predicated region body
PF: predicated region fallthrough
CT: control target
= control target key end

     0   :  { %18 = vsyncpa [#allocation5], 0  ;;  %s845_s0 = inlined_call_operand.<no memory space> [shape: s32[1], index: 0, kind: input, shape index: {}]   ;;  %s846_s1 = inlined_call_operand.vmem [shape: bf16[16,32], index: 1, kind: input, shape index: {}]   ;;  %s847_s2 = inlined_call_operand.vmem [shape: bf16[16,16], index: 2, kind: input, shape index: {}]   ;;  %s848_s3 = inlined_call_operand.vmem [shape: bf16[16,32], index: 3, kind: input, shape index: {}]   ;;  %s849_s4 = inlined_call_operand.hbm [shape: bf16[32,128], index: 4, kind: input, shape index: {}]   ;;  %s850_s5 = inlined_call_operand.hbm [shape: bf16[16,128], index: 5, kind: input, shape index: {}]   ;;  %s851_s6 = inlined_call_operand.hbm [shape: bf16[32,128], index: 6, kind: input, shape index: {}]   ;;  %s852_s7 = inlined_call_operand.vmem [shape: f32[1,128], index: 7, kind: input, shape index: {}]   ;;  %s853_s8 = inlined_call_operand.vmem [shape: bf16[128,128], index: 8, kind: input, shape index: {}]   ;;  %s854_s9 = inlined_call_operand.vmem [shape: f32[1,128], index: 9, kind: input, shape index: {}]   ;;  %s855_s10 = inlined_call_operand.hbm [shape: f32[16,128], index: 10, kind: output, shape index: {0}]   ;;  %s856_s11 = inlined_call_operand.vmem [shape: f32[16,128], index: 11, kind: output, shape index: {1}]  }
   0x1   :  { %19 = vsyncpa [#allocation8], 0 }
   0x2   :  { %20 = vsyncpa [#allocation6], 0  ;;  %s662_s16 = smov [#allocation7]   ;;  %s663_s18 = smov [#allocation4]  }
   0x3   :  { %s44_s17 = sshll.u32 %s662_s16, 4  ;;  %s32_s19 = sshll.u32 %s663_s18, 4  ;;  %s45_s17 = int_to_ptr.vmem [resolvable:$true] %s44_s17  ;;  %s732_s19 = int_to_ptr.vmem [resolvable:$true] %s32_s19 }
   0x4   :  { %s568_s22 = scalar_lea.hbm %s850_s5, 128 }
   0x5   :  { %p569_p0 = scmp.ne.s32.totalorder %s850_s5, %s568_s22  ;;  %p572_p1 = scmp.lt.u32.totalorder %s568_s22, %s850_s5 }
   0x7   :  { %p574_p2 = pnand %p572_p1, %p569_p0 }
   0x9   :  { %577 = shalt.err (!%p574_p2)
}
   0xa   :  { %s578_s0 = scalar_lea.vmem %s45_s17, 128  ;;  %p583_p4 = scmp.lt.s32.totalorder %s45_s17, %s45_s17 }
   0xb   :  { %p579_p3 = scmp.ne.s32.totalorder %s45_s17, %s578_s0  ;;  %p584_p5 = scmp.lt.s32.totalorder %s578_s0, %s578_s0 }
   0xd   :  { %p585_p6 = por %p584_p5, %p583_p4 }
   0xf   :  { %p586_p7 = pnand %p585_p6, %p579_p3 }
  0x11   :  { %589 = shalt.err (!%p586_p7)
}
  0x12   :  { %s664_s27 = smov 64   ;;  %s665_s28 = smov 4  }
  0x13   :  { %50 = dma.hbm_to_vmem [thread:$0]  %s850_s5, 128, %s45_s17, [#allocation8], %s664_s27, %s664_s27, %s665_s28  }
  0x14   :  { %s590_s14 = scalar_lea.hbm %s849_s4, 256 }
  0x15   :  { %p591_p8 = scmp.ne.s32.totalorder %s849_s4, %s590_s14  ;;  %p594_p9 = scmp.lt.u32.totalorder %s590_s14, %s849_s4 }
  0x17   :  { %p596_p10 = pnand %p594_p9, %p591_p8 }
  0x19   :  { %599 = shalt.err (!%p596_p10)
}
  0x1a   :  { %s600_s21 = scalar_lea.vmem %s732_s19, 256  ;;  %p605_p12 = scmp.lt.s32.totalorder %s732_s19, %s732_s19 }
  0x1b   :  { %p601_p11 = scmp.ne.s32.totalorder %s732_s19, %s600_s21  ;;  %p606_p13 = scmp.lt.s32.totalorder %s600_s21, %s600_s21 }
  0x1d   :  { %p607_p0 = por %p606_p13, %p605_p12 }
  0x1f   :  { %p608_p1 = pnand %p607_p0, %p601_p11 }
  0x21   :  { %611 = shalt.err (!%p608_p1)
}
  0x22   :  { %38 = dma.hbm_to_vmem [thread:$0]  %s849_s4, 256, %s732_s19, [#allocation5], %s664_s27, %s664_s27, %s665_s28  }
  0x23   :  { %s666_s22 = smov [#allocation9]   ;;  %s612_s26 = scalar_lea.hbm %s851_s6, 256 }
  0x24   :  { %s56_s23 = sshll.u32 %s666_s22, 4  ;;  %p613_p2 = scmp.ne.s32.totalorder %s851_s6, %s612_s26  ;;  %s57_s23 = int_to_ptr.vmem [resolvable:$true] %s56_s23 }
  0x25   :  { %p616_p3 = scmp.lt.u32.totalorder %s612_s26, %s851_s6 }
  0x27   :  { %p618_p4 = pnand %p616_p3, %p613_p2 }
  0x29   :  { %621 = shalt.err (!%p618_p4)
}
  0x2a   :  { %s622_s13 = scalar_lea.vmem %s57_s23, 256  ;;  %p627_p6 = scmp.lt.s32.totalorder %s57_s23, %s57_s23 }
  0x2b   :  { %p623_p5 = scmp.ne.s32.totalorder %s57_s23, %s622_s13  ;;  %p628_p7 = scmp.lt.s32.totalorder %s622_s13, %s622_s13 }
  0x2d   :  { %p629_p8 = por %p628_p7, %p627_p6 }
  0x2f   :  { %p630_p9 = pnand %p629_p8, %p623_p5 }
  0x31   :  { %633 = shalt.err (!%p630_p9)
}
  0x32   :  { %62 = dma.hbm_to_vmem [thread:$0]  %s851_s6, 256, %s57_s23, [#allocation8], %s664_s27, %s664_s27, %s665_s28  }
  0x33   :  { %656 = dma.done.wait [#allocation5], 256  }
  0x34   :  { %657 = vsyncadd [#allocation5], 4294967040 }
  0x35   :  { %658 = dma.done.wait [#allocation8], 384  }
  0x36   :  { %659 = vsyncadd [#allocation8], 4294966912  ;;  %v667_v0 = vmov 0.0   ;;  %vm668_vm0 = vmmov 0   ;;  %v540_v1 = vld [vmem:[#allocation7] sm:$0xff]   ;;  %v541_v2 = vld [vmem:[%s847_s2] sm:$0xff]  }
  0x37   :  { %488 = vmatprep.subr.bf16.mxu0 %v667_v0  ;;  %490 = vmatprep.mubr.msk.bf16.mxu0 %vm668_vm0, %v667_v0  ;;  %vm100_vm1 = vcmask 130048   ;;  %v542_v3 = vld [vmem:[#allocation4] sm:$0xff]   ;;  %v543_v4 = vld [vmem:[#allocation4 + $0x8] sm:$0xff]   ;;  %vm162_vm2 = vcmask 261120   ;;  %v545_v6 = vld [vmem:[#allocation9] sm:$0xff]  }
  0x38   :  { %510 = vmatprep.subr.bf16.mxu1 %v667_v0  ;;  %526 = vmatprep.mubr.msk.bf16.mxu1 %vm668_vm0, %v667_v0  ;;  %v544_v5 = vld [vmem:[%s846_s1] sm:$0xff]   ;;  %v549_v10 = vld [vmem:[%s853_s8 + $0x8] sm:$0xff]   ;;  %v550_v11 = vld [vmem:[%s853_s8 + $0x10] sm:$0xff]  }
  0x39   :  { %489 = vmatpush3.bf16.msra.mxu0 %v540_v1  ;;  %v546_v7 = vld [vmem:[#allocation9 + $0x8] sm:$0xff]   ;;  %v551_v12 = vld [vmem:[%s853_s8 + $0x18] sm:$0xff]   ;;  %v553_v14 = vld [vmem:[%s853_s8 + $0x28] sm:$0xff]  }
  0x3a   :  { %494 = vmatprep.subr.bf16.mxu0 %v667_v0  ;;  %v547_v8 = vld [vmem:[%s848_s3] sm:$0xff]   ;;  %v554_v15 = vld [vmem:[%s853_s8 + $0x30] sm:$0xff]   ;;  %v555_v16 = vld [vmem:[%s853_s8 + $0x38] sm:$0xff]  }
  0x3b   :  { %v548_v9 = vld [vmem:[%s853_s8] sm:$0xff]  }
  0x3c   :  { %491 = vmatmul.mubr.msk.bf16.vlgmr.msra.gmra.mrb[0].mxu0 %vm100_vm1, %v541_v2  ;;  %511 = vmatpush3.bf16.msra.mxu1 %v548_v9  ;;  %v552_v13 = vld [vmem:[%s853_s8 + $0x20] sm:$0xff]  }
  0x3d   :  { %495 = vmatpush3.bf16.msra.mxu0 %v542_v3  ;;  %498 = vmatprep.mubr.msk.bf16.mxu0 %vm668_vm0, %v667_v0  ;;  %v461_v28 = vld [vmem:[%s852_s7] ss:$0 sm:$0xff]  ;;  %s669_s7 = smov [#allocation10]  }
  0x3e   :  { %496 = vmatprep.subr.bf16.mxu0 %v667_v0  ;;  %512 = vmatprep.subr.bf16.mxu1 %v667_v0  ;;  %v462_v39 = vld [vmem:[%s854_s9] ss:$0 sm:$0xff]  ;;  %s433_s9 = sshll.u32 %s669_s7, 4  ;;  %s434_s9 = int_to_ptr.vmem [resolvable:$true] %s433_s9 }
  0x3f   :  { %s634_s19 = scalar_lea.vmem %s434_s9, 256  ;;  %p639_p11 = scmp.lt.s32.totalorder %s434_s9, %s434_s9 }
  0x40   :  { %513 = vmatpush3.bf16.msra.mxu1 %v549_v10  ;;  %p635_p10 = scmp.ne.s32.totalorder %s434_s9, %s634_s19  ;;  %p640_p12 = scmp.lt.s32.totalorder %s634_s19, %s634_s19 }
  0x41   :  { %497 = vmatpush3.bf16.msra.mxu0 %v543_v4  ;;  %514 = vmatprep.subr.bf16.mxu1 %v667_v0 }
  0x42   :  { %502 = vmatprep.subr.bf16.mxu0 %v667_v0  ;;  %p641_p13 = por %p640_p12, %p639_p11 }
  0x44   :  { %499 = vmatmul.mubr.msk.bf16.vlgmr.msra.gmra.mrb[4].mxu0 %vm162_vm2, %v544_v5  ;;  %515 = vmatpush3.bf16.msra.mxu1 %v550_v11  ;;  %p642_p0 = pnand %p641_p13, %p635_p10 }
  0x45   :  { %503 = vmatpush3.bf16.msra.mxu0 %v545_v6  ;;  %506 = vmatprep.mubr.msk.bf16.mxu0 %vm668_vm0, %v667_v0 }
  0x46   :  { %504 = vmatprep.subr.bf16.mxu0 %v667_v0  ;;  %516 = vmatprep.subr.bf16.mxu1 %v667_v0 }
  0x48   :  { %517 = vmatpush3.bf16.msra.mxu1 %v551_v12 }
  0x49   :  { %505 = vmatpush3.bf16.msra.mxu0 %v546_v7  ;;  %518 = vmatprep.subr.bf16.mxu1 %v667_v0 }
  0x4c   :  { %507 = vmatmul.mubr.msk.bf16.vlgmr.msra.gmra.mrb[8].mxu0 %vm162_vm2, %v547_v8  ;;  %519 = vmatpush3.bf16.msra.mxu1 %v552_v13 }
  0x4d   :  { %520 = vmatprep.subr.bf16.mxu1 %v667_v0 }
  0x50   :  { %521 = vmatpush3.bf16.msra.mxu1 %v553_v14 }
  0x51   :  { %522 = vmatprep.subr.bf16.mxu1 %v667_v0 }
  0x54   :  { %523 = vmatpush3.bf16.msra.mxu1 %v554_v15 }
  0x55   :  { %524 = vmatprep.subr.bf16.mxu1 %v667_v0 }
  0x58   :  { %525 = vmatpush3.bf16.msra.mxu1 %v555_v16 }
 0x10f   :  { %v138_v17 = vpop.f32.mrb[0].mxu0 }
 0x110   :  { %v492_v18 = vpop.f32.mrb[1].mxu0 }
 0x111   :  { %v141_v19 = vpop.f32.mrb[2].mxu0 }
 0x112   :  { %v493_v20 = vpop.f32.mrb[3].mxu0 }
 0x117   :  { %v200_v21 = vpop.f32.mrb[4].mxu0 }
 0x118   :  { %v201_v22 = vadd.f32 %v200_v21, %v138_v17  ;;  %v500_v23 = vpop.f32.mrb[5].mxu0 }
 0x119   :  { %v203_v24 = vpop.f32.mrb[6].mxu0 }
 0x11a   :  { %v204_v25 = vadd.f32 %v203_v24, %v141_v19  ;;  %v501_v26 = vpop.f32.mrb[7].mxu0 }
 0x11f   :  { %v267_v27 = vpop.f32.mrb[8].mxu0 }
 0x120   :  { %v274_v29 = vadd.f32 %v267_v27, %v201_v22  ;;  %v508_v30 = vpop.f32.mrb[9].mxu0 }
 0x121   :  { %v270_v31 = vpop.f32.mrb[10].mxu0 }
 0x122   :  { %v283_v32 = vadd.f32 %v461_v28, %v274_v29  ;;  %v275_v33 = vadd.f32 %v270_v31, %v204_v25  ;;  %v509_v34 = vpop.f32.mrb[11].mxu0 }
 0x124   :  { %556 = vtanh.f32 %v283_v32  ;;  %v284_v35 = vadd.f32 %v461_v28, %v275_v33 }
 0x126   :  { %558 = vtanh.f32 %v284_v35 }
 0x12e   :  { %v557_v36 = vpop.eup %556 }
 0x12f   :  { %287 = vst [vmem:[#allocation10] sm:$0xff] %v557_v36 }
 0x130   :  { %v559_v37 = vpop.eup %558 }
 0x131   :  { %288 = vst [vmem:[#allocation10 + $0x8] sm:$0xff] %v559_v37  ;;  %v289_v38 = vpack.c.bf16 %v559_v37, %v557_v36 }
 0x133   :  { %527 = vmatmul.mubr.bf16.vlgmr.msra.gmra.mrb[0].mxu1 %v289_v38 }
 0x206   :  { %v395_v40 = vpop.f32.mrb[0].mxu1 }
 0x207   :  { %v396_v41 = vadd.f32 %v462_v39, %v395_v40  ;;  %v528_v42 = vpop.f32.mrb[1].mxu1 }
 0x208   :  { %v398_v43 = vpop.f32.mrb[2].mxu1 }
 0x209   :  { %402 = vmax.xlane.f32.xlu0 %v396_v41  ;;  %v529_v44 = vpop.f32.mrb[3].mxu1  ;;  %v399_v45 = vadd.f32 %v462_v39, %v398_v43 }
 0x20d   :  { %404 = vmax.xlane.f32.xlu0 %v399_v45 }
 0x296   :  { %v403_v46 = vpop.xlane.xlu0 %402 }
 0x297   :  { %v406_v47 = vsub.f32 %v396_v41, %v403_v46 }
 0x299   :  { %v408_v48 = vmul.f32 1.442695, %v406_v47 }
 0x29a   :  { %v405_v49 = vpop.xlane.xlu0 %404 }
 0x29b   :  { %560 = vpow2.f32 %v408_v48  ;;  %v407_v50 = vsub.f32 %v399_v45, %v405_v49 }
 0x29d   :  { %v410_v51 = vmul.f32 1.442695, %v407_v50 }
 0x29f   :  { %562 = vpow2.f32 %v410_v51 }
 0x2a5   :  { %v561_v52 = vpop.eup %560 }
 0x2a6   :  { %412 = vadd.xlane.f32.xlu1 %v561_v52 }
 0x2a9   :  { %v563_v53 = vpop.eup %562 }
 0x2aa   :  { %414 = vadd.xlane.f32.xlu1 %v563_v53 }
 0x2ab   :  { %645 = shalt.err (!%p642_p0)
}
 0x2ac   :  { %s646_s6 = scalar_lea.hbm %s855_s10, 256 }
 0x2ad   :  { %p647_p1 = scmp.ne.s32.totalorder %s855_s10, %s646_s6  ;;  %p650_p2 = scmp.lt.u32.totalorder %s646_s6, %s855_s10 }
 0x2af   :  { %p652_p3 = pnand %p650_p2, %p647_p1 }
 0x2b1   :  { %655 = shalt.err (!%p652_p3)
}
 0x2b2   :  { %s670_s18 = smov 128   ;;  %s671_s1 = smov 8  }
 0x2b3   :  { %439 = dma.vmem_to_hbm [thread:$0]  %s434_s9, 256, %s855_s10, [#allocation6], %s670_s18, %s670_s18, %s671_s1  }
 0x333   :  { %v413_v54 = vpop.xlane.xlu1 %412 }
 0x334   :  { %564 = vrcp.f32 %v413_v54 }
 0x337   :  { %v415_v55 = vpop.xlane.xlu1 %414 }
 0x338   :  { %566 = vrcp.f32 %v415_v55 }
 0x33e   :  { %v565_v56 = vpop.eup %564 }
 0x33f   :  { %v418_v57 = vmul.f32 %v565_v56, %v413_v54 }
 0x341   :  { %v420_v58 = vsub.f32 2.0, %v418_v57 }
 0x342   :  { %v567_v59 = vpop.eup %566 }
 0x343   :  { %v422_v60 = vmul.f32 %v565_v56, %v420_v58  ;;  %v419_v61 = vmul.f32 %v567_v59, %v415_v55 }
 0x345   :  { %v424_v62 = vmul.f32 %v561_v52, %v422_v60  ;;  %v421_v63 = vsub.f32 2.0, %v419_v61 }
 0x347   :  { %426 = vst [vmem:[%s856_s11] sm:$0xff] %v424_v62  ;;  %v423_v0 = vmul.f32 %v567_v59, %v421_v63 }
 0x349   :  { %v425_v1 = vmul.f32 %v563_v53, %v423_v0 }
 0x34b   :  { %427 = vst [vmem:[%s856_s11 + $0x8] sm:$0xff] %v425_v1 }
 0x34c   :  { %660 = dma.done.wait [#allocation6], 256  }
 0x34d   :  { %661 = vsyncadd [#allocation6], 4294967040 }
 0x34e   :  { %447 = vsyncpa [#allocation5], 1 }
 0x34f   :  { %448 = vsyncpa [#allocation8], 1 }
 0x350   :  { %449 = vsyncpa [#allocation6], 1 }

</bundles_post_ra>
